<compile_context>
chip_gen: v7x
topology: tpu7x:2x2x1
jax: 0.10.0
libtpu: 0.0.40
codegen_flags: <defaults>
</compile_context>

<pallas_src>
import functools

import jax
import jax.numpy as jnp
from jax import lax
from jax.experimental import pallas as pl
from jax.experimental.pallas import tpu as pltpu


_FAST_PATH_MAX_TABLE_BYTES = 2 * 1024 * 1024  # table fully VMEM-resident below this
_FAST_PATH_MAX_VOCAB = 1024                   # keeps one-hot FLOPs <= gather roofline
_VMEM_OUT_BUDGET_BYTES = 8 * 1024 * 1024      # budget for the double-buffered out block
_VMEM_LIMIT_BYTES = 32 * 1024 * 1024          # explicit scoped-VMEM limit (v5e..v7x safe)


def _round_up(x, m):
    return (x + m - 1) // m * m


def _choose_token_block(n_tokens, d_model):
    """Largest token block whose double-buffered f32 out block fits the budget."""
    max_tb = _VMEM_OUT_BUDGET_BYTES // (2 * d_model * 4)
    max_tb = max(128, (max_tb // 128) * 128)   # multiple of 128 when multi-block
    max_tb = min(max_tb, 1024)
    if n_tokens <= max_tb:
        # Single grid step: block equals the (padded) full array, so any
        # multiple of 8 is a legal second-minor block dim.
        return max(8, _round_up(n_tokens, 8))
    return max_tb


def _onehot_gather_kernel(ids_ref, table_ref, out_ref, *, scale, vocab_size):
    """Small-table path: table is VMEM-resident; gather = one-hot @ table (MXU).

    ids_ref:   (token_block, 1)   int32 VMEM
    table_ref: (V, D)             f32   VMEM (constant index_map -> resident)
    out_ref:   (token_block, D)   f32   VMEM output block
    """
    ids_col = ids_ref[...]                                  # (token_block, 1)
    token_block = ids_col.shape[0]
    iota = lax.broadcasted_iota(jnp.int32, (token_block, vocab_size), 1)
    one_hot = (ids_col == iota).astype(table_ref.dtype)     # (token_block, V)
    gathered = jnp.dot(one_hot, table_ref[...],
                       preferred_element_type=jnp.float32)  # (token_block, D)
    out_ref[...] = (gathered * scale).astype(out_ref.dtype)


def _hbm_row_gather_kernel(ids_ref, table_hbm, out_ref, sem, *, scale, token_block):
    """General path: per-token row DMA from HBM straight into the output block.

    ids_ref:   (n_blocks, token_block) int32 SMEM (scalar-prefetched ids)
    table_hbm: (V, D)                  f32   HBM  (memory_space=pl.ANY)
    out_ref:   (token_block, D)        f32   VMEM output block (DMA destination)
    sem:       DMA semaphore shared by all row copies of this block
    """
    blk = pl.program_id(0)

    def issue(t, carry):
        tok = ids_ref[blk, t]
        pltpu.make_async_copy(
            table_hbm.at[pl.ds(tok, 1), :],
            out_ref.at[pl.ds(t, 1), :],
            sem,
        ).start()
        return carry

    # Unrolled issue loop: descriptor issues + SMEM id loads pack per bundle.
    lax.fori_loop(0, token_block, issue, None, unroll=8)

    # DMA semaphores count bytes: one wait sized for the full (token_block, D)
    # block retires every row copy above (official paged-attention pattern),
    # instead of token_block individual waits.
    pltpu.make_async_copy(out_ref, out_ref, sem).wait()

    # Scale in place on the VPU while the block is already in VMEM.
    out_ref[...] = (out_ref[...] * scale).astype(out_ref.dtype)


def embedding_forward(ids, table, *, force_hbm_gather=False):
    """ids: (B, S) int; table: (V, D) float32 -> (B, S, D) float32."""
    B, S = ids.shape
    V, D = table.shape
    N = B * S
    scale = float(D) ** -0.5

    # TODO(synk): PyTorch raises on out-of-range ids (and supports padding_idx);
    # here out-of-range ids are clamped into [0, V-1] instead.
    ids_flat = jnp.clip(ids.reshape(N).astype(jnp.int32), 0, V - 1)

    token_block = _choose_token_block(N, D)
    n_pad = _round_up(N, token_block)
    n_blocks = n_pad // token_block
    if n_pad != N:
        ids_flat = jnp.pad(ids_flat, (0, n_pad - N))   # padded slots gather row 0

    compiler_params = pltpu.CompilerParams(
        dimension_semantics=("parallel",),             # megacore-shard token blocks
        vmem_limit_bytes=_VMEM_LIMIT_BYTES,
    )

    use_fast_path = (
        not force_hbm_gather
        and V * D * 4 <= _FAST_PATH_MAX_TABLE_BYTES
        and V <= _FAST_PATH_MAX_VOCAB
    )

    if use_fast_path:
        kernel = functools.partial(_onehot_gather_kernel, scale=scale, vocab_size=V)
        ids_col = ids_flat.reshape(n_pad, 1)           # (N_pad, 1) -> lane-broadcast friendly
        out_flat = pl.pallas_call(
            kernel,
            out_shape=jax.ShapeDtypeStruct((n_pad, D), jnp.float32),
            grid=(n_blocks,),
            in_specs=[
                pl.BlockSpec((token_block, 1), lambda i: (i, 0)),  # ids block (VMEM)
                pl.BlockSpec((V, D), lambda i: (0, 0)),            # table resident in VMEM
            ],
            out_specs=pl.BlockSpec((token_block, D), lambda i: (i, 0)),
            compiler_params=compiler_params,
            cost_estimate=pl.CostEstimate(
                flops=2 * n_pad * V * D + n_pad * D,
                transcendentals=0,
                bytes_accessed=(V * D + 2 * n_pad * D + n_pad) * 4,
            ),
        )(ids_col, table)
    else:
        kernel = functools.partial(_hbm_row_gather_kernel, scale=scale,
                                   token_block=token_block)
        # 2-D SMEM prefetch: pads to (ceil(n_blocks/8)*8, ceil(tb/128)*128) words,
        # i.e. linear in N, unlike 1-D SMEM's next_pow2(4N) blowup.
        ids_blocks = ids_flat.reshape(n_blocks, token_block)
        out_flat = pl.pallas_call(
            kernel,
            out_shape=jax.ShapeDtypeStruct((n_pad, D), jnp.float32),
            grid_spec=pltpu.PrefetchScalarGridSpec(
                num_scalar_prefetch=1,                      # ids -> SMEM
                grid=(n_blocks,),
                in_specs=[
                    pl.BlockSpec(memory_space=pl.ANY),      # table stays in HBM
                ],
                out_specs=pl.BlockSpec((token_block, D), lambda i, ids: (i, 0)),
                scratch_shapes=[
                    pltpu.SemaphoreType.DMA,
                ],
            ),
            compiler_params=compiler_params,
            cost_estimate=pl.CostEstimate(
                flops=n_pad * D,                            # the scale multiply
                transcendentals=0,
                bytes_accessed=2 * n_pad * D * 4 + n_pad * 4,
            ),
        )(ids_blocks, table)

    return out_flat[:N].reshape(B, S, D)


if __name__ == "__main__":
    vocab_size = 64
    d_model = 128
    batch, seq = 2, 8

    key = jax.random.PRNGKey(0)
    k_ids, k_tab = jax.random.split(key)

    # Deterministic "parameters" for nn.Embedding(vocab_size, d_model):
    table = jax.random.normal(k_tab, (vocab_size, d_model), dtype=jnp.float32)
    # Deterministic input token ids:
    ids = jax.random.randint(k_ids, (batch, seq), 0, vocab_size, dtype=jnp.int32)

    # Reference (same semantics as the PyTorch module: embedding * d_model**-0.5)
    ref = table[ids] * (d_model ** -0.5)

    # Small-table fast path (table VMEM-resident, MXU gather).
    out_fast = jax.block_until_ready(embedding_forward(ids, table))
    assert out_fast.shape == (batch, seq, d_model)
    assert jnp.allclose(out_fast, ref, atol=1e-6), "fast path mismatch vs reference"

    # General HBM row-gather path (forced, to exercise it at small shapes too).
    out_gather = jax.block_until_ready(
        embedding_forward(ids, table, force_hbm_gather=True))
    assert out_gather.shape == (batch, seq, d_model)
    assert jnp.allclose(out_gather, ref, atol=1e-6), "gather path mismatch vs reference"

    print("KERNEL_OK")
</pallas_src>

<mosaic_0001>
module attributes {stable_mosaic.version = 11 : i64} {
  func.func @_onehot_gather_kernel(%arg0: i32, %arg1: memref<16x1xi32, #tpu.memory_space<vmem>>, %arg2: memref<64x128xf32, #tpu.memory_space<vmem>>, %arg3: memref<16x128xf32, #tpu.memory_space<vmem>>) attributes {dimension_semantics = [#tpu.dimension_semantics<parallel>], iteration_bounds = array<i64: 1>, scalar_prefetch = 0 : i64, scratch_operands = 0 : i64, tpu.core_type = #tpu.core_type<tc>, window_params = [{transform_indices = @transform_0, window_bounds = array<i64: 16, 1>}, {pipeline_mode = #tpu.pipeline_mode<synchronous>, transform_indices = @transform_1, window_bounds = array<i64: 64, 128>}, {transform_indices = @transform_2, window_bounds = array<i64: 16, 128>}]} {
    %c0 = arith.constant 0 : index
    %c0_0 = arith.constant 0 : index
    %0 = vector.load %arg1[%c0, %c0_0] : memref<16x1xi32, #tpu.memory_space<vmem>>, vector<16x1xi32>
    %1 = tpu.iota {dimensions = array<i32: 1>} : vector<16x64xi32>
    %2 = vector.broadcast %0 : vector<16x1xi32> to vector<16x64xi32>
    %3 = arith.cmpi eq, %2, %1 : vector<16x64xi32>
    %4 = arith.extui %3 : vector<16x64xi1> to vector<16x64xi32>
    %5 = arith.sitofp %4 : vector<16x64xi32> to vector<16x64xf32>
    %c0_1 = arith.constant 0 : index
    %c0_2 = arith.constant 0 : index
    %6 = vector.load %arg2[%c0_1, %c0_2] : memref<64x128xf32, #tpu.memory_space<vmem>>, vector<64x128xf32>
    %cst = arith.constant dense<0.000000e+00> : vector<16x128xf32>
    %7 = tpu.matmul %5, %6, %cst {dimension_numbers = #tpu.dot_dimension_numbers<[1], [0], [0], [1], [0, 0, 1, 1], [], []>} : vector<16x64xf32>, vector<64x128xf32>, vector<16x128xf32> -> vector<16x128xf32>
    %cst_3 = arith.constant 0.0883883461 : f32
    %8 = vector.broadcast %cst_3 : f32 to vector<16x128xf32>
    %9 = arith.mulf %7, %8 : vector<16x128xf32>
    %c0_4 = arith.constant 0 : index
    %c0_5 = arith.constant 0 : index
    %10 = vector.load %arg3[%c0_4, %c0_5] : memref<16x128xf32, #tpu.memory_space<vmem>>, vector<16x128xf32>
    tpu.vector_store %arg3[%c0_4, %c0_5], %9 {strides = array<i32>} : memref<16x128xf32, #tpu.memory_space<vmem>>, vector<16x128xf32>,
    return
  }
  func.func @transform_0(%arg0: i32) -> (i32, i32) {
    %c0_i32 = arith.constant 0 : i32
    %c0_i32_0 = arith.constant 0 : i32
    return %arg0, %c0_i32 : i32, i32
  }
  func.func @transform_1(%arg0: i32) -> (i32, i32) {
    %c0_i32 = arith.constant 0 : i32
    %c0_i32_0 = arith.constant 0 : i32
    %c0_i32_1 = arith.constant 0 : i32
    return %c0_i32, %c0_i32_0 : i32, i32
  }
  func.func @transform_2(%arg0: i32) -> (i32, i32) {
    %c0_i32 = arith.constant 0 : i32
    %c0_i32_0 = arith.constant 0 : i32
    return %arg0, %c0_i32 : i32, i32
  }
}

</mosaic_0001>

<bundles_post_ra>
// kernel: tpu_custom_call.1
= control target key start
LH: loop header
LB: loop body
LE: loop exit
PB: predicated region body
PF: predicated region fallthrough
CT: control target
= control target key end

     0   :  { %7 = vsyncpa [#allocation3], 0  ;;  %s314_s0 = inlined_call_operand.vmem [shape: s32[16,1], index: 0, kind: input, shape index: {}]   ;;  %s315_s1 = inlined_call_operand.hbm [shape: f32[64,128], index: 1, kind: input, shape index: {}]   ;;  %s316_s2 = inlined_call_operand.hbm [shape: f32[16,128], index: 2, kind: output, shape index: {}]  }
   0x1   :  { %8 = vsyncpa [#allocation4], 0  ;;  %s257_s9 = smov [#allocation2]   ;;  %s209_s13 = scalar_lea.hbm %s315_s1, 1024 }
   0x2   :  { %s16_s10 = sshll.u32 %s257_s9, 4  ;;  %p210_p0 = scmp.ne.s32.totalorder %s315_s1, %s209_s13  ;;  %s17_s10 = int_to_ptr.vmem [resolvable:$true] %s16_s10 }
   0x3   :  { %p213_p1 = scmp.lt.u32.totalorder %s209_s13, %s315_s1 }
   0x5   :  { %p215_p2 = pnand %p213_p1, %p210_p0 }
   0x7   :  { %218 = shalt.err (!%p215_p2)
}
   0x8   :  { %s219_s18 = scalar_lea.vmem %s17_s10, 1024  ;;  %p224_p4 = scmp.lt.s32.totalorder %s17_s10, %s17_s10 }
   0x9   :  { %p220_p3 = scmp.ne.s32.totalorder %s17_s10, %s219_s18  ;;  %p225_p5 = scmp.lt.s32.totalorder %s219_s18, %s219_s18 }
   0xb   :  { %p226_p6 = por %p225_p5, %p224_p4 }
   0xd   :  { %p227_p7 = pnand %p226_p6, %p220_p3 }
   0xf   :  { %230 = shalt.err (!%p227_p7)
}
  0x10   :  { %s258_s19 = smov 128   ;;  %s259_s20 = smov 8  }
  0x11   :  { %22 = dma.hbm_to_vmem [thread:$0]  %s315_s1, 1024, %s17_s10, [#allocation3], %s258_s19, %s258_s19, %s259_s20  }
  0x12   :  { %253 = dma.done.wait [#allocation3], 1024  }
  0x13   :  { %254 = vsyncadd [#allocation3], 4294966272  ;;  %v260_v0 = vmov 0   ;;  %v26_v1 = vld [vmem:[%s314_s0] sm:$0xff]  ;;  %v43_v3 = vld [vmem:[#allocation2 + $0x8] sm:$0xff]  ;;  %v28_v15 = vlaneseq  ;;  %vm50_vm0 = vcmask 523264  }
  0x14   :  { %208 = vset.pattern.permute.xlu0 %v260_v0  ;;  %v42_v2 = vld [vmem:[#allocation2] sm:$0xff]  ;;  %v44_v4 = vld [vmem:[#allocation2 + $0x10] sm:$0xff]  ;;  %v45_v5 = vld [vmem:[#allocation2 + $0x18] sm:$0xff]  ;;  %v261_v18 = vmov 0.0  }
  0x15   :  { %31 = vperm.xlu0 %208, %v26_v1   ;;  %v27_v6 = vld [vmem:[%s314_s0 + $0x8] sm:$0xff]  ;;  %v186_v7 = vpack.c.bf16 %v43_v3, %v42_v2  ;;  %v190_v8 = vpack.c.bf16 %v45_v5, %v44_v4  ;;  %v46_v9 = vld [vmem:[#allocation2 + $0x20] sm:$0xff]  ;;  %v48_v12 = vld [vmem:[#allocation2 + $0x30] sm:$0xff]  ;;  %v29_v16 = vand.u32 127, %v28_v15  ;;  %s262_s0 = smov [#allocation5]  }
  0x16   :  { %v47_v10 = vld [vmem:[#allocation2 + $0x28] sm:$0xff]  ;;  %v49_v13 = vld [vmem:[#allocation2 + $0x38] sm:$0xff]  ;;  %s141_s1 = sshll.u32 %s262_s0, 4  ;;  %s142_s1 = int_to_ptr.vmem [resolvable:$true] %s141_s1 }
  0x17   :  { %187 = vmatprep.subr.bf16.mxu0 %v186_v7  ;;  %v194_v11 = vpack.c.bf16 %v47_v10, %v46_v9  ;;  %v198_v14 = vpack.c.bf16 %v49_v13, %v48_v12  ;;  %s231_s27 = scalar_lea.vmem %s142_s1, 256  ;;  %p236_p9 = scmp.lt.s32.totalorder %s142_s1, %s142_s1 }
  0x18   :  { %189 = vmatpush3.bf16.msra.mxu0 %v186_v7  ;;  %p232_p8 = scmp.ne.s32.totalorder %s142_s1, %s231_s27  ;;  %p237_p10 = scmp.lt.s32.totalorder %s231_s27, %s231_s27 }
  0x19   :  { %34 = vperm.xlu0 %208, %v27_v6   ;;  %191 = vmatprep.subr.bf16.mxu0 %v190_v8 }
  0x1a   :  { %p238_p11 = por %p237_p10, %p236_p9 }
  0x1c   :  { %193 = vmatpush3.bf16.msra.mxu0 %v190_v8  ;;  %p239_p12 = pnand %p238_p11, %p232_p8 }
  0x1d   :  { %195 = vmatprep.subr.bf16.mxu0 %v194_v11 }
  0x20   :  { %197 = vmatpush3.bf16.msra.mxu0 %v194_v11 }
  0x21   :  { %199 = vmatprep.subr.bf16.mxu0 %v198_v14 }
  0x24   :  { %201 = vmatpush3.bf16.msra.mxu0 %v198_v14 }
  0x94   :  { %v32_v17 = vpop.permute.xlu0 %31 }
  0x95   :  { %vm36_vm1 = vcmp.eq.s32.totalorder %v32_v17, %v29_v16 }
  0x96   :  { %v153_v19 = vsel %vm36_vm1, 1.0, %v261_v18 }
  0x97   :  { %183 = vmatprep.mubr.msk.f32.mxu0 %vm50_vm0, %v153_v19 }
  0x98   :  { %v35_v20 = vpop.permute.xlu0 %34 }
  0x99   :  { %vm37_vm2 = vcmp.eq.s32.totalorder %v35_v20, %v29_v16 }
  0x9a   :  { %v154_v21 = vsel %vm37_vm2, 1.0, %v261_v18 }
  0x9b   :  { %184 = vmatmul.mubr.msk.f32.vlgmr.msra.gmra.mrb[0].mxu0 %vm50_vm0, %v154_v21 }
 0x16e   :  { %v185_v22 = vpop.f32.mrb[0].mxu0 }
 0x16f   :  { %v133_v23 = vmul.f32 0.088388346, %v185_v22  ;;  %v123_v24 = vpop.f32.mrb[1].mxu0 }
 0x170   :  { %v132_v25 = vmul.f32 0.088388346, %v123_v24 }
 0x171   :  { %135 = vst [vmem:[#allocation5 + $0x8] sm:$0xff] %v133_v23 }
 0x172   :  { %134 = vst [vmem:[#allocation5] sm:$0xff] %v132_v25 }
 0x173   :  { %242 = shalt.err (!%p239_p12)
}
 0x174   :  { %s243_s30 = scalar_lea.hbm %s316_s2, 256 }
 0x175   :  { %p244_p13 = scmp.ne.s32.totalorder %s316_s2, %s243_s30  ;;  %p247_p0 = scmp.lt.u32.totalorder %s243_s30, %s316_s2 }
 0x177   :  { %p249_p1 = pnand %p247_p0, %p244_p13 }
 0x179   :  { %252 = shalt.err (!%p249_p1)
}
 0x17a   :  { %147 = dma.vmem_to_hbm [thread:$0]  %s142_s1, 256, %s316_s2, [#allocation4], %s258_s19, %s258_s19, %s259_s20  }
 0x17b   :  { %255 = dma.done.wait [#allocation4], 256  }
 0x17c   :  { %256 = vsyncadd [#allocation4], 4294967040 }
 0x17d   :  { %151 = vsyncpa [#allocation3], 1 }
 0x17e   :  { %152 = vsyncpa [#allocation4], 1 }

</bundles_post_ra>
